<compile_context>
chip_gen: v7x
topology: tpu7x:2x2x1
jax: 0.10.0
libtpu: 0.0.40
codegen_flags: <defaults>
</compile_context>

<pallas_src>
import functools

import jax
import jax.numpy as jnp
from jax.experimental import pallas as pl
from jax.experimental.pallas import tpu as pltpu

BN_EPS = 1e-5
C_PAD = 128            # padded channel / lane width of activations & outputs
P_ROWS = 16            # rows of the packed scale/shift/bias slab ((8,128)-aligned)
MAX_TB = 2048          # max batch-tile rows (working set stays << VMEM limits)
MIN_PALLAS_BATCH = 256 # below this, plain XLA beats the kernel-launch floor


def _round_up(x, m):
    return (x + m - 1) // m * m


def _cdiv(a, b):
    return -(-a // b)


# ----------------------------------------------------------------------------
# Fused math for both heads (shared by the Pallas kernel and the XLA fallback)
# ----------------------------------------------------------------------------
def _fused_heads_math(x, w_first, w_stack, p):
    """x: (N, c_in) -- [latent_shape | latent_rgb] rows.
    w_first: (c_in, 128) bf16 block-diag conv1 of bottleneck-0 (x @ W^T form).
    w_stack: (4, 128, 128) bf16 [w2a, w1b, w2b, wproj] (array or Ref).
    p: (16, 128) f32 rows: s1a,h1a,s2a,h2a, s1b,h1b,s2b,h2b, bias, pad.
    Returns (N, 128) f32 slab [proj_sdf | proj_rgb | zeros]."""
    n, c_in = x.shape

    def mxu(v, w):
        # bf16 MXU operands, f32 accumulation
        return jnp.dot(v.astype(jnp.bfloat16), w,
                       preferred_element_type=jnp.float32)

    x_f32 = x.astype(jnp.float32)
    if c_in == C_PAD:
        resid0 = x_f32
    else:  # residual of bottleneck-0 on 128 lanes (padded lanes stay zero)
        resid0 = jnp.concatenate(
            [x_f32, jnp.zeros((n, C_PAD - c_in), jnp.float32)], axis=-1)

    # bottleneck 0: conv1 has K = c_in (no lane padding on the input stream)
    out = mxu(x, w_first)                               # conv1 (1x1, no bias)
    out = jnp.maximum(out * p[0:1] + p[1:2], 0.0)       # bn1 + relu
    out = mxu(out, w_stack[0])                          # conv2
    v = jnp.maximum(out * p[2:3] + p[3:4] + resid0, 0.0)  # bn2 + residual + relu

    # bottleneck 1
    out = mxu(v, w_stack[1])
    out = jnp.maximum(out * p[4:5] + p[5:6], 0.0)
    out = mxu(out, w_stack[2])
    v = jnp.maximum(out * p[6:7] + p[7:8] + v, 0.0)

    # combined final nn.Linear (both heads side by side on lanes)
    return mxu(v, w_stack[3]) + p[8:9]


# ----------------------------------------------------------------------------
# Pallas kernel: both projection heads (2x Bottleneck_Linear + Linear), fused.
# ----------------------------------------------------------------------------
def _dual_head_kernel(x_ref, wf_ref, w_ref, p_ref, o_ref):
    # x_ref:  (TB, c_in)  f32   -- latent rows straight from HBM (no pre-pad)
    # wf_ref: (c_in, 128) bf16  -- block-diag conv1 of bottleneck-0
    # w_ref:  (4, 128, 128) bf16-- [w2a, w1b, w2b, wproj] (VMEM-resident)
    # p_ref:  (16, 128) f32     -- BN scale/shift rows + combined bias
    # o_ref:  (TB, 128)         -- [proj_sdf | proj_rgb | zeros] lane-dense slab
    y = _fused_heads_math(x_ref[...], wf_ref[...], w_ref, p_ref[...])
    o_ref[...] = y.astype(o_ref.dtype)


def _tile_plan(batch):
    """Pick (TB, B_pad): >=2 even grid steps when there is enough work (v7x
    megacore), tiles capped at MAX_TB, batch-padding waste bounded."""
    b8 = _round_up(max(batch, 1), 8)
    n_steps = max(2 if b8 >= 16 else 1, _cdiv(b8, MAX_TB))
    if n_steps > 1 and n_steps % 2:
        n_steps += 1                       # even split across the 2 TCs
    tb = min(MAX_TB, _round_up(_cdiv(b8, n_steps), 8))
    n_steps = _cdiv(b8, tb)
    return tb, n_steps * tb


def dual_proj_heads(latent_raw, packed, proj_dim_sdf, proj_dim_rgb,
                    *, out_dtype=jnp.float32, use_pallas=None):
    """latent_raw: (B, c_total) f32. Returns (proj_sdf, proj_rgb)."""
    B, c_total = latent_raw.shape
    w_first = packed["w_first"]   # (c_total, 128) bf16
    w_stack = packed["w_stack"]   # (4, 128, 128) bf16
    p_slab = packed["p_slab"]     # (16, 128) f32
    assert w_first.shape[0] == c_total

    if use_pallas is None:
        use_pallas = B >= MIN_PALLAS_BATCH

    if not use_pallas:
        # tiny-batch path: launch/DMA floor dominates; run the same math in XLA
        out = _fused_heads_math(latent_raw, w_first, w_stack, p_slab)
    else:
        TB, B_pad = _tile_plan(B)
        x = latent_raw
        if B_pad != B:
            x = jnp.pad(x, ((0, B_pad - B), (0, 0)))   # batch-only pad

        itemsize_in = jnp.dtype(latent_raw.dtype).itemsize
        itemsize_out = jnp.dtype(out_dtype).itemsize
        cost = pl.CostEstimate(
            flops=2 * B_pad * C_PAD * (c_total + 3 * C_PAD),
            transcendentals=0,
            bytes_accessed=B_pad * (c_total * itemsize_in + C_PAD * itemsize_out),
        )

        out = pl.pallas_call(
            _dual_head_kernel,
            out_shape=jax.ShapeDtypeStruct((B_pad, C_PAD), out_dtype),
            grid=(B_pad // TB,),
            in_specs=[
                # last block dim == full array dim -> legal without 128 padding
                pl.BlockSpec((TB, c_total), lambda i: (i, 0)),
                # constant index_maps -> weights / param slab stay VMEM-resident
                pl.BlockSpec(w_first.shape, lambda i: (0, 0)),
                pl.BlockSpec(w_stack.shape, lambda i: (0, 0, 0)),
                pl.BlockSpec(p_slab.shape, lambda i: (0, 0)),
            ],
            out_specs=pl.BlockSpec((TB, C_PAD), lambda i: (i, 0)),
            compiler_params=pltpu.CompilerParams(
                dimension_semantics=("parallel",)),
            cost_estimate=cost,
        )(x, w_first, w_stack, p_slab)

    proj_sdf = out[:B, :proj_dim_sdf]
    proj_rgb = out[:B, proj_dim_sdf:proj_dim_sdf + proj_dim_rgb]
    return proj_sdf, proj_rgb


# ----------------------------------------------------------------------------
# Deterministic parameter construction (mirrors the nn.Module __init__ shapes)
# ----------------------------------------------------------------------------
def _make_bottleneck_raw(key, n_channels):
    k = jax.random.split(key, 8)
    # Conv2d(C, C, 1, bias=False) weight: (C_out, C_in, 1, 1) -> (C_out, C_in)
    w1 = 0.2 * jax.random.normal(k[0], (n_channels, n_channels), jnp.float32)
    w2 = 0.2 * jax.random.normal(k[1], (n_channels, n_channels), jnp.float32)
    # BatchNorm2d (eval mode): gamma, beta, running_mean, running_var
    g1 = 1.0 + 0.1 * jax.random.normal(k[2], (n_channels,), jnp.float32)
    b1 = 0.1 * jax.random.normal(k[3], (n_channels,), jnp.float32)
    m1 = 0.1 * jax.random.normal(k[4], (n_channels,), jnp.float32)
    v1 = 0.5 + jnp.abs(jax.random.normal(k[5], (n_channels,), jnp.float32))
    g2 = 1.0 + 0.1 * jax.random.normal(k[6], (n_channels,), jnp.float32)
    b2 = 0.1 * jax.random.normal(k[7], (n_channels,), jnp.float32)
    m2 = jnp.zeros((n_channels,), jnp.float32)
    v2 = jnp.ones((n_channels,), jnp.float32)
    return dict(w1=w1, w2=w2, bn1=(g1, b1, m1, v1), bn2=(g2, b2, m2, v2))


def make_head_raw_params(key, latent_dim, proj_dim):
    kb0, kb1, kw, kb = jax.random.split(key, 4)
    return dict(
        b0=_make_bottleneck_raw(kb0, latent_dim),
        b1=_make_bottleneck_raw(kb1, latent_dim),
        # nn.Linear(latent_dim, proj_dim): weight (P, C), bias (P,)
        w=0.2 * jax.random.normal(kw, (proj_dim, latent_dim), jnp.float32),
        b=0.1 * jax.random.normal(kb, (proj_dim,), jnp.float32),
    )


def _fuse_bn(gamma, beta, mean, var):
    scale = gamma / jnp.sqrt(var + BN_EPS)
    shift = beta - mean * scale
    return scale, shift


def pack_dual_heads(shape_params, rgb_params, c_shape, c_rgb, p_sdf, p_rgb):
    """Pack both heads into block-diagonal bf16 weights + one f32 param slab."""
    c_total = c_shape + c_rgb
    assert c_total <= C_PAD and (p_sdf + p_rgb) <= C_PAD

    def conv_pad(w_s, w_r, rows):
        # combined block-diag conv weight, transposed so kernel computes x @ W^T
        w = jnp.zeros((rows, C_PAD), jnp.float32)
        w = w.at[:c_shape, :c_shape].set(w_s.T)
        w = w.at[c_shape:c_total, c_shape:c_total].set(w_r.T)
        return w

    def bn_pad(bn_s, bn_r):
        s_s, h_s = _fuse_bn(*bn_s)
        s_r, h_r = _fuse_bn(*bn_r)
        s = jnp.zeros((C_PAD,), jnp.float32)
        s = s.at[:c_shape].set(s_s).at[c_shape:c_total].set(s_r)
        h = jnp.zeros((C_PAD,), jnp.float32)
        h = h.at[:c_shape].set(h_s).at[c_shape:c_total].set(h_r)
        return s, h  # padded lanes keep scale=shift=0 -> stay exactly zero

    # first conv of bottleneck-0 has K = c_total (input stream is not lane-padded)
    w_first = conv_pad(shape_params["b0"]["w1"], rgb_params["b0"]["w1"], c_total)
    w2a = conv_pad(shape_params["b0"]["w2"], rgb_params["b0"]["w2"], C_PAD)
    w1b = conv_pad(shape_params["b1"]["w1"], rgb_params["b1"]["w1"], C_PAD)
    w2b = conv_pad(shape_params["b1"]["w2"], rgb_params["b1"]["w2"], C_PAD)
    s1a, h1a = bn_pad(shape_params["b0"]["bn1"], rgb_params["b0"]["bn1"])
    s2a, h2a = bn_pad(shape_params["b0"]["bn2"], rgb_params["b0"]["bn2"])
    s1b, h1b = bn_pad(shape_params["b1"]["bn1"], rgb_params["b1"]["bn1"])
    s2b, h2b = bn_pad(shape_params["b1"]["bn2"], rgb_params["b1"]["bn2"])

    # combined final projection: [sdf | rgb] outputs side by side on lanes
    wp = jnp.zeros((C_PAD, C_PAD), jnp.float32)
    wp = wp.at[:c_shape, :p_sdf].set(shape_params["w"].T)
    wp = wp.at[c_shape:c_total, p_sdf:p_sdf + p_rgb].set(rgb_params["w"].T)
    bp = jnp.zeros((C_PAD,), jnp.float32)
    bp = bp.at[:p_sdf].set(shape_params["b"]).at[p_sdf:p_sdf + p_rgb].set(rgb_params["b"])

    w_stack = jnp.stack([w2a, w1b, w2b, wp]).astype(jnp.bfloat16)
    rows = jnp.stack([s1a, h1a, s2a, h2a, s1b, h1b, s2b, h2b, bp])
    p_slab = jnp.zeros((P_ROWS, C_PAD), jnp.float32).at[:rows.shape[0]].set(rows)
    return dict(w_first=w_first.astype(jnp.bfloat16), w_stack=w_stack,
                p_slab=p_slab)


# ----------------------------------------------------------------------------
# Pure-JAX reference (same bf16-MXU / f32-epilogue numerics as the kernel)
# ----------------------------------------------------------------------------
def _proj_head_ref(x, p):
    def mxu(v, w):
        return jnp.dot(v.astype(jnp.bfloat16), w.astype(jnp.bfloat16),
                       preferred_element_type=jnp.float32)

    def bottleneck(v, bp):
        s1, h1 = _fuse_bn(*bp["bn1"])
        s2, h2 = _fuse_bn(*bp["bn2"])
        o = jnp.maximum(mxu(v, bp["w1"].T) * s1 + h1, 0.0)
        o = mxu(o, bp["w2"].T) * s2 + h2 + v   # residual stays f32 (as in kernel)
        return jnp.maximum(o, 0.0)

    v = x.astype(jnp.float32)
    v = bottleneck(v, p["b0"])
    v = bottleneck(v, p["b1"])
    return mxu(v, p["w"].T) + p["b"]


# ----------------------------------------------------------------------------
# Graph-level glue: single fused call covers both projection heads.
# ----------------------------------------------------------------------------
@functools.partial(jax.jit,
                   static_argnames=("proj_dim_sdf", "proj_dim_rgb", "use_pallas"))
def graph_latent_proj_forward(latent_raw, packed, proj_dim_sdf, proj_dim_rgb,
                              use_pallas=None):
    # Graph.forward path: var.latent_raw = var.latent -> proj_latent_sdf / proj_latent_rgb
    return dual_proj_heads(latent_raw, packed, proj_dim_sdf, proj_dim_rgb,
                           use_pallas=use_pallas)


if __name__ == "__main__":
    # small shapes: batch=2, latent_dim_shape=32, latent_dim_rgb=32,
    # proj_latent_dim (sdf)=16, proj_latent_dim (rgb)=16
    B = 2
    LATENT_DIM_SHAPE = 32
    LATENT_DIM_RGB = 32
    PROJ_DIM_SDF = 16
    PROJ_DIM_RGB = 16

    key = jax.random.PRNGKey(0)
    k_lat, k_shape, k_rgb = jax.random.split(key, 3)

    # var.latent provided directly (Graph uses var.latent when present,
    # bypassing the torchvision encoder).
    latent_raw = jax.random.normal(
        k_lat, (B, LATENT_DIM_SHAPE + LATENT_DIM_RGB), jnp.float32)

    shape_raw = make_head_raw_params(k_shape, LATENT_DIM_SHAPE, PROJ_DIM_SDF)
    rgb_raw = make_head_raw_params(k_rgb, LATENT_DIM_RGB, PROJ_DIM_RGB)
    packed = pack_dual_heads(shape_raw, rgb_raw,
                             LATENT_DIM_SHAPE, LATENT_DIM_RGB,
                             PROJ_DIM_SDF, PROJ_DIM_RGB)

    # force the Pallas path so the kernel is exercised even at the demo batch
    proj_sdf, proj_rgb = graph_latent_proj_forward(
        latent_raw, packed, PROJ_DIM_SDF, PROJ_DIM_RGB, use_pallas=True)
    proj_sdf = jax.block_until_ready(proj_sdf)
    proj_rgb = jax.block_until_ready(proj_rgb)

    # tiny-batch XLA fallback (auto-dispatch path for B < MIN_PALLAS_BATCH)
    xla_sdf, xla_rgb = graph_latent_proj_forward(
        latent_raw, packed, PROJ_DIM_SDF, PROJ_DIM_RGB, use_pallas=False)
    xla_sdf = jax.block_until_ready(xla_sdf)
    xla_rgb = jax.block_until_ready(xla_rgb)

    # correctness check against pure-JAX reference
    ref_sdf = _proj_head_ref(latent_raw[:, :LATENT_DIM_SHAPE], shape_raw)
    ref_rgb = _proj_head_ref(latent_raw[:, LATENT_DIM_SHAPE:], rgb_raw)
    assert proj_sdf.shape == (B, PROJ_DIM_SDF)
    assert proj_rgb.shape == (B, PROJ_DIM_RGB)
    assert jnp.allclose(proj_sdf, ref_sdf, atol=2e-3, rtol=2e-3)
    assert jnp.allclose(proj_rgb, ref_rgb, atol=2e-3, rtol=2e-3)
    assert jnp.allclose(xla_sdf, ref_sdf, atol=2e-3, rtol=2e-3)
    assert jnp.allclose(xla_rgb, ref_rgb, atol=2e-3, rtol=2e-3)

    print("KERNEL_OK")
</pallas_src>

<mosaic_0001>
module attributes {stable_mosaic.version = 11 : i64} {
  func.func @_dual_head_kernel(%arg0: i32, %arg1: memref<8x64xf32, #tpu.memory_space<vmem>>, %arg2: memref<64x128xbf16, #tpu.memory_space<vmem>>, %arg3: memref<4x128x128xbf16, #tpu.memory_space<vmem>>, %arg4: memref<16x128xf32, #tpu.memory_space<vmem>>, %arg5: memref<8x128xf32, #tpu.memory_space<vmem>>) attributes {dimension_semantics = [#tpu.dimension_semantics<parallel>], iteration_bounds = array<i64: 1>, scalar_prefetch = 0 : i64, scratch_operands = 0 : i64, tpu.core_type = #tpu.core_type<tc>, window_params = [{transform_indices = @transform_0, window_bounds = array<i64: 8, 64>}, {pipeline_mode = #tpu.pipeline_mode<synchronous>, transform_indices = @transform_1, window_bounds = array<i64: 64, 128>}, {pipeline_mode = #tpu.pipeline_mode<synchronous>, transform_indices = @transform_2, window_bounds = array<i64: 4, 128, 128>}, {pipeline_mode = #tpu.pipeline_mode<synchronous>, transform_indices = @transform_3, window_bounds = array<i64: 16, 128>}, {transform_indices = @transform_4, window_bounds = array<i64: 8, 128>}]} {
    %c0 = arith.constant 0 : index
    %c0_0 = arith.constant 0 : index
    %0 = vector.load %arg1[%c0, %c0_0] : memref<8x64xf32, #tpu.memory_space<vmem>>, vector<8x64xf32>
    %c0_1 = arith.constant 0 : index
    %c0_2 = arith.constant 0 : index
    %1 = vector.load %arg2[%c0_1, %c0_2] : memref<64x128xbf16, #tpu.memory_space<vmem>>, vector<64x128xbf16>
    %c0_3 = arith.constant 0 : index
    %c0_4 = arith.constant 0 : index
    %2 = vector.load %arg4[%c0_3, %c0_4] : memref<16x128xf32, #tpu.memory_space<vmem>>, vector<16x128xf32>
    %cst = arith.constant 0.000000e+00 : f32
    %3 = vector.broadcast %cst : f32 to vector<8x64xf32>
    %4 = tpu.concatenate %0, %3 in 1 : vector<8x64xf32>, vector<8x64xf32> -> vector<8x128xf32>
    %5 = arith.truncf %0 : vector<8x64xf32> to vector<8x64xbf16>
    %cst_5 = arith.constant dense<0.000000e+00> : vector<8x128xf32>
    %6 = tpu.matmul %5, %1, %cst_5 {dimension_numbers = #tpu.dot_dimension_numbers<[1], [0], [0], [1], [0, 0, 1, 1], [], []>} : vector<8x64xbf16>, vector<64x128xbf16>, vector<8x128xf32> -> vector<8x128xf32>
    %7 = vector.extract_strided_slice %2 {offsets = [0, 0], sizes = [1, 128], strides = [1, 1]} : vector<16x128xf32> to vector<1x128xf32>
    %8 = vector.broadcast %7 : vector<1x128xf32> to vector<8x128xf32>
    %9 = arith.mulf %6, %8 : vector<8x128xf32>
    %10 = vector.extract_strided_slice %2 {offsets = [1, 0], sizes = [1, 128], strides = [1, 1]} : vector<16x128xf32> to vector<1x128xf32>
    %11 = vector.broadcast %10 : vector<1x128xf32> to vector<8x128xf32>
    %12 = arith.addf %9, %11 : vector<8x128xf32>
    %cst_6 = arith.constant 0.000000e+00 : f32
    %13 = vector.broadcast %cst_6 : f32 to vector<8x128xf32>
    %14 = arith.maximumf %12, %13 : vector<8x128xf32>
    %c0_7 = arith.constant 0 : index
    %c0_8 = arith.constant 0 : index
    %c0_9 = arith.constant 0 : index
    %15 = vector.load %arg3[%c0_7, %c0_8, %c0_9] : memref<4x128x128xbf16, #tpu.memory_space<vmem>>, vector<1x128x128xbf16>
    %16 = vector.shape_cast %15 : vector<1x128x128xbf16> to vector<128x128xbf16>
    %17 = arith.truncf %14 : vector<8x128xf32> to vector<8x128xbf16>
    %cst_10 = arith.constant dense<0.000000e+00> : vector<8x128xf32>
    %18 = tpu.matmul %17, %16, %cst_10 {dimension_numbers = #tpu.dot_dimension_numbers<[1], [0], [0], [1], [0, 0, 1, 1], [], []>} : vector<8x128xbf16>, vector<128x128xbf16>, vector<8x128xf32> -> vector<8x128xf32>
    %19 = vector.extract_strided_slice %2 {offsets = [2, 0], sizes = [1, 128], strides = [1, 1]} : vector<16x128xf32> to vector<1x128xf32>
    %20 = vector.broadcast %19 : vector<1x128xf32> to vector<8x128xf32>
    %21 = arith.mulf %18, %20 : vector<8x128xf32>
    %22 = vector.extract_strided_slice %2 {offsets = [3, 0], sizes = [1, 128], strides = [1, 1]} : vector<16x128xf32> to vector<1x128xf32>
    %23 = vector.broadcast %22 : vector<1x128xf32> to vector<8x128xf32>
    %24 = arith.addf %21, %23 : vector<8x128xf32>
    %25 = arith.addf %24, %4 : vector<8x128xf32>
    %cst_11 = arith.constant 0.000000e+00 : f32
    %26 = vector.broadcast %cst_11 : f32 to vector<8x128xf32>
    %27 = arith.maximumf %25, %26 : vector<8x128xf32>
    %c1 = arith.constant 1 : index
    %c0_12 = arith.constant 0 : index
    %c0_13 = arith.constant 0 : index
    %28 = vector.load %arg3[%c1, %c0_12, %c0_13] : memref<4x128x128xbf16, #tpu.memory_space<vmem>>, vector<1x128x128xbf16>
    %29 = vector.shape_cast %28 : vector<1x128x128xbf16> to vector<128x128xbf16>
    %30 = arith.truncf %27 : vector<8x128xf32> to vector<8x128xbf16>
    %cst_14 = arith.constant dense<0.000000e+00> : vector<8x128xf32>
    %31 = tpu.matmul %30, %29, %cst_14 {dimension_numbers = #tpu.dot_dimension_numbers<[1], [0], [0], [1], [0, 0, 1, 1], [], []>} : vector<8x128xbf16>, vector<128x128xbf16>, vector<8x128xf32> -> vector<8x128xf32>
    %32 = vector.extract_strided_slice %2 {offsets = [4, 0], sizes = [1, 128], strides = [1, 1]} : vector<16x128xf32> to vector<1x128xf32>
    %33 = vector.broadcast %32 : vector<1x128xf32> to vector<8x128xf32>
    %34 = arith.mulf %31, %33 : vector<8x128xf32>
    %35 = vector.extract_strided_slice %2 {offsets = [5, 0], sizes = [1, 128], strides = [1, 1]} : vector<16x128xf32> to vector<1x128xf32>
    %36 = vector.broadcast %35 : vector<1x128xf32> to vector<8x128xf32>
    %37 = arith.addf %34, %36 : vector<8x128xf32>
    %cst_15 = arith.constant 0.000000e+00 : f32
    %38 = vector.broadcast %cst_15 : f32 to vector<8x128xf32>
    %39 = arith.maximumf %37, %38 : vector<8x128xf32>
    %c2 = arith.constant 2 : index
    %c0_16 = arith.constant 0 : index
    %c0_17 = arith.constant 0 : index
    %40 = vector.load %arg3[%c2, %c0_16, %c0_17] : memref<4x128x128xbf16, #tpu.memory_space<vmem>>, vector<1x128x128xbf16>
    %41 = vector.shape_cast %40 : vector<1x128x128xbf16> to vector<128x128xbf16>
    %42 = arith.truncf %39 : vector<8x128xf32> to vector<8x128xbf16>
    %cst_18 = arith.constant dense<0.000000e+00> : vector<8x128xf32>
    %43 = tpu.matmul %42, %41, %cst_18 {dimension_numbers = #tpu.dot_dimension_numbers<[1], [0], [0], [1], [0, 0, 1, 1], [], []>} : vector<8x128xbf16>, vector<128x128xbf16>, vector<8x128xf32> -> vector<8x128xf32>
    %44 = vector.extract_strided_slice %2 {offsets = [6, 0], sizes = [1, 128], strides = [1, 1]} : vector<16x128xf32> to vector<1x128xf32>
    %45 = vector.broadcast %44 : vector<1x128xf32> to vector<8x128xf32>
    %46 = arith.mulf %43, %45 : vector<8x128xf32>
    %47 = vector.extract_strided_slice %2 {offsets = [7, 0], sizes = [1, 128], strides = [1, 1]} : vector<16x128xf32> to vector<1x128xf32>
    %48 = vector.broadcast %47 : vector<1x128xf32> to vector<8x128xf32>
    %49 = arith.addf %46, %48 : vector<8x128xf32>
    %50 = arith.addf %49, %27 : vector<8x128xf32>
    %cst_19 = arith.constant 0.000000e+00 : f32
    %51 = vector.broadcast %cst_19 : f32 to vector<8x128xf32>
    %52 = arith.maximumf %50, %51 : vector<8x128xf32>
    %c3 = arith.constant 3 : index
    %c0_20 = arith.constant 0 : index
    %c0_21 = arith.constant 0 : index
    %53 = vector.load %arg3[%c3, %c0_20, %c0_21] : memref<4x128x128xbf16, #tpu.memory_space<vmem>>, vector<1x128x128xbf16>
    %54 = vector.shape_cast %53 : vector<1x128x128xbf16> to vector<128x128xbf16>
    %55 = arith.truncf %52 : vector<8x128xf32> to vector<8x128xbf16>
    %cst_22 = arith.constant dense<0.000000e+00> : vector<8x128xf32>
    %56 = tpu.matmul %55, %54, %cst_22 {dimension_numbers = #tpu.dot_dimension_numbers<[1], [0], [0], [1], [0, 0, 1, 1], [], []>} : vector<8x128xbf16>, vector<128x128xbf16>, vector<8x128xf32> -> vector<8x128xf32>
    %57 = vector.extract_strided_slice %2 {offsets = [8, 0], sizes = [1, 128], strides = [1, 1]} : vector<16x128xf32> to vector<1x128xf32>
    %58 = vector.broadcast %57 : vector<1x128xf32> to vector<8x128xf32>
    %59 = arith.addf %56, %58 : vector<8x128xf32>
    %c0_23 = arith.constant 0 : index
    %c0_24 = arith.constant 0 : index
    %60 = vector.load %arg5[%c0_23, %c0_24] : memref<8x128xf32, #tpu.memory_space<vmem>>, vector<8x128xf32>
    tpu.vector_store %arg5[%c0_23, %c0_24], %59 {strides = array<i32>} : memref<8x128xf32, #tpu.memory_space<vmem>>, vector<8x128xf32>,
    return
  }
  func.func @transform_0(%arg0: i32) -> (i32, i32) {
    %c0_i32 = arith.constant 0 : i32
    %c0_i32_0 = arith.constant 0 : i32
    return %arg0, %c0_i32 : i32, i32
  }
  func.func @transform_1(%arg0: i32) -> (i32, i32) {
    %c0_i32 = arith.constant 0 : i32
    %c0_i32_0 = arith.constant 0 : i32
    %c0_i32_1 = arith.constant 0 : i32
    return %c0_i32, %c0_i32_0 : i32, i32
  }
  func.func @transform_2(%arg0: i32) -> (i32, i32, i32) {
    %c0_i32 = arith.constant 0 : i32
    %c0_i32_0 = arith.constant 0 : i32
    %c0_i32_1 = arith.constant 0 : i32
    %c0_i32_2 = arith.constant 0 : i32
    return %c0_i32, %c0_i32_0, %c0_i32_1 : i32, i32, i32
  }
  func.func @transform_3(%arg0: i32) -> (i32, i32) {
    %c0_i32 = arith.constant 0 : i32
    %c0_i32_0 = arith.constant 0 : i32
    %c0_i32_1 = arith.constant 0 : i32
    return %c0_i32, %c0_i32_0 : i32, i32
  }
  func.func @transform_4(%arg0: i32) -> (i32, i32) {
    %c0_i32 = arith.constant 0 : i32
    %c0_i32_0 = arith.constant 0 : i32
    return %arg0, %c0_i32 : i32, i32
  }
}

</mosaic_0001>

<bundles_post_ra>
// kernel: graph_latent_proj_forward.1
= control target key start
LH: loop header
LB: loop body
LE: loop exit
PB: predicated region body
PF: predicated region fallthrough
CT: control target
= control target key end

     0   :  { %9 = vsyncpa [#allocation3], 0  ;;  %s1063_s0 = inlined_call_operand.vmem [shape: f32[8,64], index: 0, kind: input, shape index: {}]   ;;  %s1064_s1 = inlined_call_operand.hbm [shape: bf16[64,128], index: 1, kind: input, shape index: {}]   ;;  %s1065_s2 = inlined_call_operand.hbm [shape: bf16[4,128,128], index: 2, kind: input, shape index: {}]   ;;  %s1066_s3 = inlined_call_operand.hbm [shape: f32[16,128], index: 3, kind: input, shape index: {}]   ;;  %s1067_s4 = inlined_call_operand.vmem [shape: f32[8,128], index: 4, kind: output, shape index: {}]  }
   0x1   :  { %10 = vsyncpa [#allocation5], 0  ;;  %s905_s15 = smov [#allocation4]   ;;  %s906_s17 = smov [#allocation2]  }
   0x2   :  { %s30_s16 = sshll.u32 %s905_s15, 4  ;;  %s18_s18 = sshll.u32 %s906_s17, 4  ;;  %s31_s16 = int_to_ptr.vmem [resolvable:$true] %s30_s16  ;;  %s939_s18 = int_to_ptr.vmem [resolvable:$true] %s18_s18 }
   0x3   :  { %s835_s21 = scalar_lea.hbm %s1065_s2, 4096 }
   0x4   :  { %p836_p0 = scmp.ne.s32.totalorder %s1065_s2, %s835_s21  ;;  %p839_p1 = scmp.lt.u32.totalorder %s835_s21, %s1065_s2 }
   0x6   :  { %p841_p2 = pnand %p839_p1, %p836_p0 }
   0x8   :  { %844 = shalt.err (!%p841_p2)
}
   0x9   :  { %s845_s26 = scalar_lea.vmem %s31_s16, 4096  ;;  %p850_p4 = scmp.lt.s32.totalorder %s31_s16, %s31_s16 }
   0xa   :  { %p846_p3 = scmp.ne.s32.totalorder %s31_s16, %s845_s26  ;;  %p851_p5 = scmp.lt.s32.totalorder %s845_s26, %s845_s26 }
   0xc   :  { %p852_p6 = por %p851_p5, %p850_p4 }
   0xe   :  { %p853_p7 = pnand %p852_p6, %p846_p3 }
  0x10   :  { %856 = shalt.err (!%p853_p7)
}
  0x11   :  { %s907_s27 = smov 64   ;;  %s908_s28 = smov 4  }
  0x12   :  { %36 = dma.hbm_to_vmem [thread:$0]  %s1065_s2, 4096, %s31_s16, [#allocation5], %s907_s27, %s907_s27, %s908_s28  }
  0x13   :  { %s857_s7 = scalar_lea.hbm %s1064_s1, 512 }
  0x14   :  { %p858_p8 = scmp.ne.s32.totalorder %s1064_s1, %s857_s7  ;;  %p861_p9 = scmp.lt.u32.totalorder %s857_s7, %s1064_s1 }
  0x16   :  { %p863_p10 = pnand %p861_p9, %p858_p8 }
  0x18   :  { %866 = shalt.err (!%p863_p10)
}
  0x19   :  { %s867_s12 = scalar_lea.vmem %s939_s18, 512  ;;  %p872_p12 = scmp.lt.s32.totalorder %s939_s18, %s939_s18 }
  0x1a   :  { %p868_p11 = scmp.ne.s32.totalorder %s939_s18, %s867_s12  ;;  %p873_p13 = scmp.lt.s32.totalorder %s867_s12, %s867_s12 }
  0x1c   :  { %p874_p0 = por %p873_p13, %p872_p12 }
  0x1e   :  { %p875_p1 = pnand %p874_p0, %p868_p11 }
  0x20   :  { %878 = shalt.err (!%p875_p1)
}
  0x21   :  { %24 = dma.hbm_to_vmem [thread:$0]  %s1064_s1, 512, %s939_s18, [#allocation3], %s907_s27, %s907_s27, %s908_s28  }
  0x22   :  { %s909_s14 = smov [#allocation6]   ;;  %s879_s19 = scalar_lea.hbm %s1066_s3, 256 }
  0x23   :  { %s42_s15 = sshll.u32 %s909_s14, 4  ;;  %p880_p2 = scmp.ne.s32.totalorder %s1066_s3, %s879_s19  ;;  %s43_s15 = int_to_ptr.vmem [resolvable:$true] %s42_s15 }
  0x24   :  { %p883_p3 = scmp.lt.u32.totalorder %s879_s19, %s1066_s3 }
  0x26   :  { %p885_p4 = pnand %p883_p3, %p880_p2 }
  0x28   :  { %888 = shalt.err (!%p885_p4)
}
  0x29   :  { %s889_s24 = scalar_lea.vmem %s43_s15, 256  ;;  %p894_p6 = scmp.lt.s32.totalorder %s43_s15, %s43_s15 }
  0x2a   :  { %p890_p5 = scmp.ne.s32.totalorder %s43_s15, %s889_s24  ;;  %p895_p7 = scmp.lt.s32.totalorder %s889_s24, %s889_s24 }
  0x2c   :  { %p896_p8 = por %p895_p7, %p894_p6 }
  0x2e   :  { %p897_p9 = pnand %p896_p8, %p890_p5 }
  0x30   :  { %900 = shalt.err (!%p897_p9)
}
  0x31   :  { %s910_s1 = smov 128   ;;  %s911_s18 = smov 8  }
  0x32   :  { %48 = dma.hbm_to_vmem [thread:$0]  %s1066_s3, 256, %s43_s15, [#allocation5], %s910_s1, %s910_s1, %s911_s18  }
  0x33   :  { %901 = dma.done.wait [#allocation3], 512  }
  0x34   :  { %902 = vsyncadd [#allocation3], 4294966784 }
  0x35   :  { %903 = dma.done.wait [#allocation5], 4352  }
  0x36   :  { %904 = vsyncadd [#allocation5], 4294962944  ;;  %v912_v0 = vmov 0.0   ;;  %vm913_vm0 = vmmov 0   ;;  %v799_v1 = vld [vmem:[#allocation2] sm:$0xff]   ;;  %v800_v2 = vld [vmem:[#allocation2 + $0x8] sm:$0xff]   ;;  %v140_v21 = vlaneseq }
  0x37   :  { %698 = vmatprep.subr.bf16.mxu0 %v912_v0  ;;  %706 = vmatprep.mubr.msk.bf16.mxu0 %vm913_vm0, %v912_v0  ;;  %v59_v3 = vld [vmem:[%s1063_s0] sm:$0xff]  ;;  %vm70_vm1 = vcmask 523264   ;;  %v801_v6 = vld [vmem:[#allocation2 + $0x10] sm:$0xff]   ;;  %v804_v7 = vld [vmem:[#allocation4 + $0x8] sm:$0xff]  }
  0x38   :  { %710 = vmatprep.subr.bf16.mxu1 %v912_v0  ;;  %726 = vmatprep.mubr.msk.bf16.mxu1 %vm913_vm0, %v912_v0  ;;  %v993_v4 = vsel %vm70_vm1, %v59_v3, 0.0  ;;  %v803_v5 = vld [vmem:[#allocation4] sm:$0xff]   ;;  %v802_v8 = vld [vmem:[#allocation2 + $0x18] sm:$0xff]   ;;  %v805_v9 = vld [vmem:[#allocation4 + $0x10] sm:$0xff]   ;;  %v72_v10 = vpack.c.bf16 %v59_v3, %v59_v3  ;;  %v1014_v22 = vshrl.u32 %v140_v21, 7 }
  0x39   :  { %699 = vmatpush3.bf16.msra.mxu0 %v799_v1  ;;  %711 = vmatpush3.bf16.msra.mxu1 %v803_v5  ;;  %v806_v11 = vld [vmem:[#allocation4 + $0x18] sm:$0xff]   ;;  %v807_v12 = vld [vmem:[#allocation4 + $0x20] sm:$0xff]   ;;  %v808_v13 = vld [vmem:[#allocation4 + $0x28] sm:$0xff]  }
  0x3a   :  { %700 = vmatprep.subr.bf16.mxu0 %v912_v0  ;;  %712 = vmatprep.subr.bf16.mxu1 %v912_v0  ;;  %v809_v14 = vld [vmem:[#allocation4 + $0x30] sm:$0xff]   ;;  %v810_v15 = vld [vmem:[#allocation4 + $0x38] sm:$0xff]   ;;  %v811_v16 = vld [vmem:[#allocation4 + $0x40] sm:$0xff]   ;;  %v142_v23 = vsub.s32 0, %v1014_v22  ;;  %v147_v25 = vsub.s32 1, %v1014_v22  ;;  %v258_v45 = vsub.s32 2, %v1014_v22 }
  0x3b   :  { %v812_v17 = vld [vmem:[#allocation4 + $0x48] sm:$0xff]   ;;  %v813_v18 = vld [vmem:[#allocation4 + $0x50] sm:$0xff]   ;;  %v814_v19 = vld [vmem:[#allocation4 + $0x58] sm:$0xff]   ;;  %v263_v46 = vsub.s32 3, %v1014_v22  ;;  %v381_v3 = vsub.s32 5, %v1014_v22 }
  0x3c   :  { %v815_v20 = vld [vmem:[#allocation4 + $0x60] sm:$0xff]   ;;  %v816_v36 = vld [vmem:[#allocation4 + $0x68] sm:$0xff]   ;;  %v817_v37 = vld [vmem:[#allocation4 + $0x70] sm:$0xff]  }
  0x3d   :  { %701 = vmatpush3.bf16.msra.mxu0 %v800_v2  ;;  %713 = vmatpush3.bf16.msra.mxu1 %v804_v7  ;;  %v1017_v24 = vld [vmem:[#allocation6] sm:$0xff]  ;;  %v818_v38 = vld [vmem:[#allocation4 + $0x78] sm:$0xff]   ;;  %v820_v40 = vld [vmem:[#allocation4 + $0x88] sm:$0xff]   ;;  %v376_v2 = vsub.s32 4, %v1014_v22 }
  0x3e   :  { %702 = vmatprep.subr.bf16.mxu0 %v912_v0  ;;  %714 = vmatprep.subr.bf16.mxu1 %v912_v0  ;;  %v143_v26 = vrot.slane %v1017_v24, %v142_v23  ;;  %v148_v27 = vrot.slane %v1017_v24, %v147_v25  ;;  %v819_v39 = vld [vmem:[#allocation4 + $0x80] sm:$0xff]   ;;  %v821_v41 = vld [vmem:[#allocation4 + $0x90] sm:$0xff]   ;;  %v822_v42 = vld [vmem:[#allocation4 + $0x98] sm:$0xff]   ;;  %v259_v47 = vrot.slane %v1017_v24, %v258_v45 }
  0x3f   :  { %v823_v43 = vld [vmem:[#allocation4 + $0xa0] sm:$0xff]   ;;  %v824_v44 = vld [vmem:[#allocation4 + $0xa8] sm:$0xff]   ;;  %v264_v48 = vrot.slane %v1017_v24, %v263_v46  ;;  %v825_v58 = vld [vmem:[#allocation4 + $0xb0] sm:$0xff]   ;;  %v382_v5 = vrot.slane %v1017_v24, %v381_v3 }
  0x40   :  { %v826_v59 = vld [vmem:[#allocation4 + $0xb8] sm:$0xff]   ;;  %v827_v60 = vld [vmem:[#allocation4 + $0xc0] sm:$0xff]   ;;  %v828_v61 = vld [vmem:[#allocation4 + $0xc8] sm:$0xff]  }
  0x41   :  { %703 = vmatpush3.bf16.msra.mxu0 %v801_v6  ;;  %715 = vmatpush3.bf16.msra.mxu1 %v805_v9  ;;  %v829_v62 = vld [vmem:[#allocation4 + $0xd0] sm:$0xff]   ;;  %v830_v63 = vld [vmem:[#allocation4 + $0xd8] sm:$0xff]   ;;  %v831_v1 = vld [vmem:[#allocation4 + $0xe0] sm:$0xff]  }
  0x42   :  { %704 = vmatprep.subr.bf16.mxu0 %v912_v0  ;;  %716 = vmatprep.subr.bf16.mxu1 %v912_v0 }
  0x45   :  { %705 = vmatpush3.bf16.msra.mxu0 %v802_v8  ;;  %717 = vmatpush3.bf16.msra.mxu1 %v806_v11 }
  0x46   :  { %730 = vmatprep.subr.bf16.mxu0 %v912_v0  ;;  %718 = vmatprep.subr.bf16.mxu1 %v912_v0 }
  0x48   :  { %707 = vmatmul.mubr.msk.bf16.vlgmr.msra.gmra.mrb[0].mxu0 %vm70_vm1, %v72_v10 }
  0x49   :  { %746 = vmatprep.mubr.msk.bf16.mxu0 %vm913_vm0, %v912_v0  ;;  %719 = vmatpush3.bf16.msra.mxu1 %v807_v12 }
  0x4a   :  { %720 = vmatprep.subr.bf16.mxu1 %v912_v0  ;;  %731 = vmatpush3.bf16.msra.mxu0 %v811_v16  ;;  %v834_v16 = vld [vmem:[#allocation4 + $0xf8] sm:$0xff]  }
  0x4b   :  { %732 = vmatprep.subr.bf16.mxu0 %v912_v0 }
  0x4d   :  { %721 = vmatpush3.bf16.msra.mxu1 %v808_v13 }
  0x4e   :  { %722 = vmatprep.subr.bf16.mxu1 %v912_v0  ;;  %733 = vmatpush3.bf16.msra.mxu0 %v812_v17  ;;  %v493_v17 = vsub.s32 6, %v1014_v22 }
  0x4f   :  { %734 = vmatprep.subr.bf16.mxu0 %v912_v0 }
  0x51   :  { %723 = vmatpush3.bf16.msra.mxu1 %v809_v14  ;;  %v832_v14 = vld [vmem:[#allocation4 + $0xe8] sm:$0xff]  }
  0x52   :  { %724 = vmatprep.subr.bf16.mxu1 %v912_v0  ;;  %735 = vmatpush3.bf16.msra.mxu0 %v813_v18  ;;  %v498_v18 = vsub.s32 7, %v1014_v22 }
  0x53   :  { %736 = vmatprep.subr.bf16.mxu0 %v912_v0 }
  0x55   :  { %725 = vmatpush3.bf16.msra.mxu1 %v810_v15  ;;  %v833_v15 = vld [vmem:[#allocation4 + $0xf0] sm:$0xff]  }
  0x56   :  { %750 = vmatprep.subr.bf16.mxu1 %v912_v0  ;;  %737 = vmatpush3.bf16.msra.mxu0 %v814_v19  ;;  %v494_v19 = vrot.slane %v1017_v24, %v493_v17 }
  0x57   :  { %738 = vmatprep.subr.bf16.mxu0 %v912_v0 }
  0x5a   :  { %739 = vmatpush3.bf16.msra.mxu0 %v815_v20  ;;  %v499_v20 = vrot.slane %v1017_v24, %v498_v18 }
  0x5b   :  { %740 = vmatprep.subr.bf16.mxu0 %v912_v0 }
  0x5e   :  { %741 = vmatpush3.bf16.msra.mxu0 %v816_v36 }
  0x5f   :  { %742 = vmatprep.subr.bf16.mxu0 %v912_v0 }
  0x62   :  { %743 = vmatpush3.bf16.msra.mxu0 %v817_v37 }
  0x63   :  { %744 = vmatprep.subr.bf16.mxu0 %v912_v0 }
  0x66   :  { %745 = vmatpush3.bf16.msra.mxu0 %v818_v38 }
  0x67   :  { %770 = vmatprep.subr.bf16.mxu0 %v912_v0 }
 0x11b   :  { %v134_v28 = vpop.f32.mrb[0].mxu0 }
 0x11c   :  { %v144_v29 = vmul.f32 %v143_v26, %v134_v28  ;;  %v708_v30 = vpop.f32.mrb[1].mxu0 }
 0x11d   :  { %v137_v31 = vpop.f32.mrb[2].mxu0 }
 0x11e   :  { %v149_v32 = vadd.f32 %v148_v27, %v144_v29  ;;  %v709_v33 = vpop.f32.mrb[3].mxu0 }
 0x120   :  { %v150_v34 = vmax.f32 %v149_v32, 0.0 }
 0x122   :  { %v167_v35 = vpack.c.bf16 %v150_v34, %v150_v34 }
 0x124   :  { %727 = vmatmul.mubr.bf16.vlgmr.msra.gmra.mrb[0].mxu1 %v167_v35 }
 0x125   :  { %766 = vmatprep.mubr.msk.bf16.mxu1 %vm913_vm0, %v912_v0  ;;  %751 = vmatpush3.bf16.msra.mxu1 %v819_v39 }
 0x126   :  { %752 = vmatprep.subr.bf16.mxu1 %v912_v0 }
 0x129   :  { %753 = vmatpush3.bf16.msra.mxu1 %v820_v40 }
 0x12a   :  { %754 = vmatprep.subr.bf16.mxu1 %v912_v0 }
 0x12d   :  { %755 = vmatpush3.bf16.msra.mxu1 %v821_v41 }
 0x12e   :  { %756 = vmatprep.subr.bf16.mxu1 %v912_v0 }
 0x131   :  { %757 = vmatpush3.bf16.msra.mxu1 %v822_v42 }
 0x132   :  { %758 = vmatprep.subr.bf16.mxu1 %v912_v0 }
 0x135   :  { %759 = vmatpush3.bf16.msra.mxu1 %v823_v43 }
 0x136   :  { %760 = vmatprep.subr.bf16.mxu1 %v912_v0 }
 0x139   :  { %761 = vmatpush3.bf16.msra.mxu1 %v824_v44 }
 0x13a   :  { %762 = vmatprep.subr.bf16.mxu1 %v912_v0 }
 0x13d   :  { %763 = vmatpush3.bf16.msra.mxu1 %v825_v58 }
 0x13e   :  { %764 = vmatprep.subr.bf16.mxu1 %v912_v0 }
 0x141   :  { %765 = vmatpush3.bf16.msra.mxu1 %v826_v59 }
 0x1f7   :  { %v250_v49 = vpop.f32.mrb[0].mxu1 }
 0x1f8   :  { %v260_v50 = vmul.f32 %v259_v47, %v250_v49  ;;  %v728_v51 = vpop.f32.mrb[1].mxu1 }
 0x1f9   :  { %v253_v52 = vpop.f32.mrb[2].mxu1 }
 0x1fa   :  { %v265_v53 = vadd.f32 %v264_v48, %v260_v50  ;;  %v729_v54 = vpop.f32.mrb[3].mxu1 }
 0x1fc   :  { %v266_v55 = vadd.f32 %v265_v53, %v993_v4  ;;  %v377_v4 = vrot.slane %v1017_v24, %v376_v2 }
 0x1fe   :  { %v267_v56 = vmax.f32 %v266_v55, 0.0 }
 0x200   :  { %v285_v57 = vpack.c.bf16 %v267_v56, %v267_v56 }
 0x202   :  { %747 = vmatmul.mubr.bf16.vlgmr.msra.gmra.mrb[4].mxu0 %v285_v57 }
 0x203   :  { %786 = vmatprep.mubr.msk.bf16.mxu0 %vm913_vm0, %v912_v0  ;;  %771 = vmatpush3.bf16.msra.mxu0 %v827_v60 }
 0x204   :  { %772 = vmatprep.subr.bf16.mxu0 %v912_v0 }
 0x207   :  { %773 = vmatpush3.bf16.msra.mxu0 %v828_v61 }
 0x208   :  { %774 = vmatprep.subr.bf16.mxu0 %v912_v0 }
 0x20b   :  { %775 = vmatpush3.bf16.msra.mxu0 %v829_v62 }
 0x20c   :  { %776 = vmatprep.subr.bf16.mxu0 %v912_v0 }
 0x20f   :  { %777 = vmatpush3.bf16.msra.mxu0 %v830_v63 }
 0x210   :  { %778 = vmatprep.subr.bf16.mxu0 %v912_v0 }
 0x213   :  { %779 = vmatpush3.bf16.msra.mxu0 %v831_v1 }
 0x214   :  { %780 = vmatprep.subr.bf16.mxu0 %v912_v0 }
 0x217   :  { %781 = vmatpush3.bf16.msra.mxu0 %v832_v14 }
 0x218   :  { %782 = vmatprep.subr.bf16.mxu0 %v912_v0 }
 0x21b   :  { %783 = vmatpush3.bf16.msra.mxu0 %v833_v15 }
 0x21c   :  { %784 = vmatprep.subr.bf16.mxu0 %v912_v0  ;;  %v69_v0 = vld [vmem:[#allocation6 + $0x8] sm:$0xff] }
 0x21d   :  { %v524_v33 = vrot.slane %v69_v0, %v142_v23 }
 0x21f   :  { %785 = vmatpush3.bf16.msra.mxu0 %v834_v16 }
 0x2d5   :  { %v368_v6 = vpop.f32.mrb[4].mxu0 }
 0x2d6   :  { %v378_v7 = vmul.f32 %v377_v4, %v368_v6  ;;  %v748_v8 = vpop.f32.mrb[5].mxu0 }
 0x2d7   :  { %v371_v9 = vpop.f32.mrb[6].mxu0 }
 0x2d8   :  { %v383_v10 = vadd.f32 %v382_v5, %v378_v7  ;;  %v749_v11 = vpop.f32.mrb[7].mxu0 }
 0x2da   :  { %v384_v12 = vmax.f32 %v383_v10, 0.0 }
 0x2dc   :  { %v402_v13 = vpack.c.bf16 %v384_v12, %v384_v12 }
 0x2de   :  { %767 = vmatmul.mubr.bf16.vlgmr.msra.gmra.mrb[4].mxu1 %v402_v13 }
 0x3b1   :  { %v485_v21 = vpop.f32.mrb[4].mxu1 }
 0x3b2   :  { %v495_v25 = vmul.f32 %v494_v19, %v485_v21  ;;  %v768_v26 = vpop.f32.mrb[5].mxu1 }
 0x3b3   :  { %v488_v27 = vpop.f32.mrb[6].mxu1 }
 0x3b4   :  { %v500_v28 = vadd.f32 %v499_v20, %v495_v25  ;;  %v769_v29 = vpop.f32.mrb[7].mxu1 }
 0x3b6   :  { %v501_v30 = vadd.f32 %v500_v28, %v267_v56 }
 0x3b8   :  { %v502_v31 = vmax.f32 %v501_v30, 0.0 }
 0x3ba   :  { %v520_v32 = vpack.c.bf16 %v502_v31, %v502_v31 }
 0x3bc   :  { %787 = vmatmul.mubr.bf16.vlgmr.msra.gmra.mrb[8].mxu0 %v520_v32 }
 0x48f   :  { %v607_v34 = vpop.f32.mrb[8].mxu0 }
 0x490   :  { %v608_v35 = vadd.f32 %v607_v34, %v524_v33  ;;  %v788_v36 = vpop.f32.mrb[9].mxu0 }
 0x491   :  { %v610_v37 = vpop.f32.mrb[10].mxu0 }
 0x492   :  { %613 = vst [vmem:[%s1067_s4] sm:$0xff] %v608_v35  ;;  %v789_v24 = vpop.f32.mrb[11].mxu0 }
 0x493   :  { %618 = vsyncpa [#allocation3], 1 }
 0x494   :  { %619 = vsyncpa [#allocation5], 1 }

</bundles_post_ra>
